<compile_context>
chip_gen: v6e
topology: v6e:2x2x1
jax: 0.10.0
libtpu: 0.0.40
codegen_flags: <defaults>
</compile_context>

<pallas_src>
import functools

import numpy as np

import jax
import jax.numpy as jnp
from jax.experimental import pallas as pl
from jax.experimental.pallas import tpu as pltpu


def _round_up(x, m):
    return ((x + m - 1) // m) * m


def _nbytes(shape, dtype):
    n = 1
    for d in shape:
        n *= int(d)
    return n * np.dtype(dtype).itemsize


# ---------------------------------------------------------------------------
# Kernel 1: batched input projection  ig = x @ w_ih + b_ih   (no recurrence)
# ---------------------------------------------------------------------------
def _input_projection_kernel(x_ref, wih_ref, bih_ref, ig_ref, *, matmul_dtype):
    # (chunk, I) @ (I, 3Hp) on the MXU; bf16 operands, f32 accumulation.
    # (astype is a no-op when matmul_dtype == float32.)
    ig_ref[...] = (
        jnp.dot(x_ref[...].astype(matmul_dtype), wih_ref[...],
                preferred_element_type=jnp.float32)
        + bih_ref[...]
    )


# ---------------------------------------------------------------------------
# Kernel 2: GRU recurrence over S, chunked; hidden carried in VMEM scratch.
# ---------------------------------------------------------------------------
def _gru_recurrence_kernel(ig_ref, h0_ref, whh_ref, bhh_ref,
                           out_ref, hn_ref, h_scratch,
                           *, hp, chunk, group, seq_len, matmul_dtype):
    """One grid step processes `chunk` timesteps.

    ig_ref:    (chunk, 3Hp) f32   precomputed input gates, order [r | z | n]
    h0_ref:    (1, Hp)      f32   initial hidden
    whh_ref:   (Hp, 3Hp)    bf16/f32 recurrent weights
    bhh_ref:   (1, 3Hp)     f32
    out_ref:   (chunk, Hp)  f32   per-step hidden states for this chunk
    hn_ref:    (1, Hp)      f32   final hidden (written on last chunk only)
    h_scratch: (1, Hp)      f32   hidden carried across grid steps
    """
    c = pl.program_id(0)
    nc = pl.num_programs(0)

    @pl.when(c == 0)
    def _():
        h_scratch[...] = h0_ref[...]

    b_hh = bhh_ref[...]                       # (1, 3Hp), small
    ragged = (seq_len % chunk) != 0           # static python bool

    def group_body(g, h):
        base = pl.multiple_of(g * group, group)
        rows = []
        for u in range(group):                # modest static unroll (group=8)
            ig = ig_ref[pl.ds(base + u, 1), :]                    # (1, 3Hp)
            # Single fused recurrence matmul: (1, Hp) @ (Hp, 3Hp); weights
            # read straight from VMEM inside the loop (no pretend-vreg hoist).
            hg = jnp.dot(h.astype(matmul_dtype), whh_ref[...],
                         preferred_element_type=jnp.float32) + b_hh
            # r|z in one sigmoid pass over a lane-aligned (1, 2Hp) slab.
            rz = jax.nn.sigmoid(ig[:, :2 * hp] + hg[:, :2 * hp])
            r = rz[:, :hp]
            z = rz[:, hp:]
            n = jnp.tanh(ig[:, 2 * hp:] + r * hg[:, 2 * hp:])
            h_new = (1.0 - z) * n + z * h
            if ragged:
                # Only needed when the (statically known) tail is padded.
                h_new = jnp.where(c * chunk + base + u < seq_len, h_new, h)
            rows.append(h_new)
            h = h_new
        # One dense (group, Hp) store instead of `group` 1-row masked stores.
        out_ref[pl.ds(base, group), :] = jnp.concatenate(
            rows, axis=0).astype(out_ref.dtype)
        return h

    h_final = jax.lax.fori_loop(0, chunk // group, group_body, h_scratch[...])
    h_scratch[...] = h_final

    @pl.when(c == nc - 1)
    def _():
        hn_ref[...] = h_final.astype(hn_ref.dtype)


# ---------------------------------------------------------------------------
# Wrapper
# ---------------------------------------------------------------------------
def encoder_rnn_forward(inputs, hidden, params, *,
                        matmul_dtype=jnp.bfloat16, group=8, max_chunk=512):
    """Pallas equivalent of EncoderRNN.forward.

    inputs: (seq_len, input_size) f32   (PyTorch views it as (S, 1, I))
    hidden: (1, 1, hidden_size)   f32
    params: w_ih (I, 3H), w_hh (H, 3H), b_ih (1, 3H), b_hh (1, 3H); gates r,z,n
    returns: outputs (S, 1, H), hidden (1, 1, H)
    """
    w_ih, w_hh, b_ih, b_hh = params
    seq_len, input_size = inputs.shape
    hidden_size = w_hh.shape[0]

    hp = _round_up(hidden_size, 128)          # lane-aligned gate slabs
    chunk = min(_round_up(seq_len, group), _round_up(max_chunk, group))
    s_pad = _round_up(seq_len, chunk)
    num_chunks = s_pad // chunk

    def pad_gates(a):                         # (..., 3H) -> (..., 3Hp) per gate
        lead = a.shape[:-1]
        a = a.reshape(lead + (3, hidden_size))
        a = jnp.pad(a, [(0, 0)] * len(lead) + [(0, 0), (0, hp - hidden_size)])
        return a.reshape(lead + (3 * hp,))

    w_ih_p = pad_gates(w_ih).astype(matmul_dtype)                     # (I, 3Hp)
    w_hh_p = jnp.pad(pad_gates(w_hh),
                     ((0, hp - hidden_size), (0, 0))).astype(matmul_dtype)
    b_ih_p = pad_gates(b_ih).astype(jnp.float32)                      # (1, 3Hp)
    b_hh_p = pad_gates(b_hh).astype(jnp.float32)
    x_p = jnp.pad(inputs.astype(jnp.float32),
                  ((0, s_pad - seq_len), (0, 0)))                     # (Sp, I)
    h0_p = jnp.pad(hidden.reshape(1, hidden_size).astype(jnp.float32),
                   ((0, 0), (0, hp - hidden_size)))                   # (1, Hp)

    # --- Kernel 1: input projection, parallel over S-chunks. ---
    proj_vmem = (_nbytes((input_size, 3 * hp), matmul_dtype)
                 + _nbytes((1, 3 * hp), jnp.float32)
                 + 2 * (_nbytes((chunk, input_size), jnp.float32)
                        + _nbytes((chunk, 3 * hp), jnp.float32))
                 + (8 << 20))
    ig = pl.pallas_call(
        functools.partial(_input_projection_kernel, matmul_dtype=matmul_dtype),
        out_shape=jax.ShapeDtypeStruct((s_pad, 3 * hp), jnp.float32),
        grid_spec=pltpu.PrefetchScalarGridSpec(
            num_scalar_prefetch=0,
            grid=(num_chunks,),
            in_specs=[pl.BlockSpec((chunk, input_size), lambda c: (c, 0)),
                      pl.BlockSpec((input_size, 3 * hp), lambda c: (0, 0)),
                      pl.BlockSpec((1, 3 * hp), lambda c: (0, 0))],
            out_specs=pl.BlockSpec((chunk, 3 * hp), lambda c: (c, 0))),
        compiler_params=pltpu.CompilerParams(
            dimension_semantics=("parallel",),
            vmem_limit_bytes=proj_vmem),
    )(x_p, w_ih_p, b_ih_p)

    # --- Kernel 2: sequential recurrence over S-chunks. ---
    rec_vmem = (_nbytes((hp, 3 * hp), matmul_dtype)
                + _nbytes((1, 3 * hp), jnp.float32)
                + 3 * _nbytes((1, hp), jnp.float32)
                + 2 * (_nbytes((chunk, 3 * hp), jnp.float32)
                       + _nbytes((chunk, hp), jnp.float32))
                + (8 << 20))
    kernel = functools.partial(
        _gru_recurrence_kernel, hp=hp, chunk=chunk, group=group,
        seq_len=seq_len, matmul_dtype=matmul_dtype)
    out_p, hn_p = pl.pallas_call(
        kernel,
        out_shape=(jax.ShapeDtypeStruct((s_pad, hp), jnp.float32),
                   jax.ShapeDtypeStruct((1, hp), jnp.float32)),
        grid_spec=pltpu.PrefetchScalarGridSpec(
            num_scalar_prefetch=0,
            grid=(num_chunks,),
            in_specs=[pl.BlockSpec((chunk, 3 * hp), lambda c: (c, 0)),
                      pl.BlockSpec((1, hp), lambda c: (0, 0)),
                      pl.BlockSpec((hp, 3 * hp), lambda c: (0, 0)),
                      pl.BlockSpec((1, 3 * hp), lambda c: (0, 0))],
            out_specs=(pl.BlockSpec((chunk, hp), lambda c: (c, 0)),
                       pl.BlockSpec((1, hp), lambda c: (0, 0))),
            scratch_shapes=[pltpu.VMEM((1, hp), jnp.float32)]),
        compiler_params=pltpu.CompilerParams(
            dimension_semantics=("arbitrary",),
            vmem_limit_bytes=rec_vmem),
    )(ig, h0_p, w_hh_p, b_hh_p)

    outputs = out_p[:seq_len, :hidden_size].reshape(seq_len, 1, hidden_size)
    h_n = hn_p[:, :hidden_size].reshape(1, 1, hidden_size)
    return outputs, h_n


def init_gru_params(key, input_size, hidden_size):
    """nn.GRU-shaped params, stored transposed & gate-concatenated:
    w_ih (I, 3H), w_hh (H, 3H), b_ih (1, 3H), b_hh (1, 3H); gate order r,z,n."""
    k1, k2, k3, k4 = jax.random.split(key, 4)
    bound = 1.0 / float(hidden_size) ** 0.5
    w_ih = jax.random.uniform(k1, (input_size, 3 * hidden_size),
                              minval=-bound, maxval=bound, dtype=jnp.float32)
    w_hh = jax.random.uniform(k2, (hidden_size, 3 * hidden_size),
                              minval=-bound, maxval=bound, dtype=jnp.float32)
    b_ih = jax.random.uniform(k3, (1, 3 * hidden_size),
                              minval=-bound, maxval=bound, dtype=jnp.float32)
    b_hh = jax.random.uniform(k4, (1, 3 * hidden_size),
                              minval=-bound, maxval=bound, dtype=jnp.float32)
    return w_ih, w_hh, b_ih, b_hh


def _reference_gru(inputs, hidden, params):
    """Pure-JAX reference (lax.scan) matching PyTorch GRU semantics."""
    w_ih, w_hh, b_ih, b_hh = params
    H = w_hh.shape[0]
    h0 = hidden.reshape(1, H)

    def step(h, x):
        ig = x[None, :] @ w_ih + b_ih
        hg = h @ w_hh + b_hh
        i_r, i_z, i_n = ig[:, :H], ig[:, H:2 * H], ig[:, 2 * H:]
        h_r, h_z, h_n = hg[:, :H], hg[:, H:2 * H], hg[:, 2 * H:]
        r = jax.nn.sigmoid(i_r + h_r)
        z = jax.nn.sigmoid(i_z + h_z)
        n = jnp.tanh(i_n + r * h_n)
        h_new = (1.0 - z) * n + z * h
        return h_new, h_new[0]

    h_n, outs = jax.lax.scan(step, h0, inputs)
    return outs.reshape(inputs.shape[0], 1, H), h_n.reshape(1, 1, H)


if __name__ == "__main__":
    seq_len, input_size, hidden_size = 8, 16, 32

    key = jax.random.PRNGKey(0)
    k_in, k_par = jax.random.split(key)

    inputs = jax.random.normal(k_in, (seq_len, input_size), dtype=jnp.float32)
    hidden = jnp.zeros((1, 1, hidden_size), dtype=jnp.float32)   # initHidden()
    params = init_gru_params(k_par, input_size, hidden_size)

    ref_out, ref_h = _reference_gru(inputs, hidden, params)

    # Exactness check: f32 matmul path must match the reference tightly.
    out_f32, h_f32 = encoder_rnn_forward(inputs, hidden, params,
                                         matmul_dtype=jnp.float32)
    out_f32 = jax.block_until_ready(out_f32)
    h_f32 = jax.block_until_ready(h_f32)
    assert out_f32.shape == (seq_len, 1, hidden_size)
    assert h_f32.shape == (1, 1, hidden_size)
    assert jnp.allclose(out_f32, ref_out, atol=1e-5, rtol=1e-5)
    assert jnp.allclose(h_f32, ref_h, atol=1e-5, rtol=1e-5)

    # Default (performance) path: bf16 matmul operands, f32 accumulation.
    outputs, h_n = encoder_rnn_forward(inputs, hidden, params)
    outputs = jax.block_until_ready(outputs)
    h_n = jax.block_until_ready(h_n)
    assert outputs.shape == (seq_len, 1, hidden_size)
    assert h_n.shape == (1, 1, hidden_size)
    assert jnp.allclose(outputs, ref_out, atol=5e-2, rtol=5e-2)
    assert jnp.allclose(h_n, ref_h, atol=5e-2, rtol=5e-2)

    print("KERNEL_OK")
</pallas_src>

<mosaic_0001>
module attributes {stable_mosaic.version = 11 : i64} {
  func.func @_input_projection_kernel(%arg0: i32, %arg1: memref<8x16xf32, #tpu.memory_space<vmem>>, %arg2: memref<16x384xf32, #tpu.memory_space<vmem>>, %arg3: memref<1x384xf32, #tpu.memory_space<vmem>>, %arg4: memref<8x384xf32, #tpu.memory_space<vmem>>) attributes {dimension_semantics = [#tpu.dimension_semantics<parallel>], iteration_bounds = array<i64: 1>, scalar_prefetch = 0 : i64, scratch_operands = 0 : i64, tpu.core_type = #tpu.core_type<tc>, window_params = [{transform_indices = @transform_0, window_bounds = array<i64: 8, 16>}, {pipeline_mode = #tpu.pipeline_mode<synchronous>, transform_indices = @transform_1, window_bounds = array<i64: 16, 384>}, {pipeline_mode = #tpu.pipeline_mode<synchronous>, transform_indices = @transform_2, window_bounds = array<i64: 1, 384>}, {transform_indices = @transform_3, window_bounds = array<i64: 8, 384>}]} {
    %c0 = arith.constant 0 : index
    %c0_0 = arith.constant 0 : index
    %0 = vector.load %arg1[%c0, %c0_0] : memref<8x16xf32, #tpu.memory_space<vmem>>, vector<8x16xf32>
    %c0_1 = arith.constant 0 : index
    %c0_2 = arith.constant 0 : index
    %1 = vector.load %arg2[%c0_1, %c0_2] : memref<16x384xf32, #tpu.memory_space<vmem>>, vector<16x384xf32>
    %cst = arith.constant dense<0.000000e+00> : vector<8x384xf32>
    %2 = tpu.matmul %0, %1, %cst {dimension_numbers = #tpu.dot_dimension_numbers<[1], [0], [0], [1], [0, 0, 1, 1], [], []>} : vector<8x16xf32>, vector<16x384xf32>, vector<8x384xf32> -> vector<8x384xf32>
    %c0_3 = arith.constant 0 : index
    %c0_4 = arith.constant 0 : index
    %3 = vector.load %arg3[%c0_3, %c0_4] : memref<1x384xf32, #tpu.memory_space<vmem>>, vector<1x384xf32>
    %4 = vector.broadcast %3 : vector<1x384xf32> to vector<8x384xf32>
    %5 = arith.addf %2, %4 : vector<8x384xf32>
    %c0_5 = arith.constant 0 : index
    %c0_6 = arith.constant 0 : index
    %6 = vector.load %arg4[%c0_5, %c0_6] : memref<8x384xf32, #tpu.memory_space<vmem>>, vector<8x384xf32>
    tpu.vector_store %arg4[%c0_5, %c0_6], %5 {strides = array<i32>} : memref<8x384xf32, #tpu.memory_space<vmem>>, vector<8x384xf32>,
    return
  }
  func.func @transform_0(%arg0: i32) -> (i32, i32) {
    %c0_i32 = arith.constant 0 : i32
    %c0_i32_0 = arith.constant 0 : i32
    return %arg0, %c0_i32 : i32, i32
  }
  func.func @transform_1(%arg0: i32) -> (i32, i32) {
    %c0_i32 = arith.constant 0 : i32
    %c0_i32_0 = arith.constant 0 : i32
    %c0_i32_1 = arith.constant 0 : i32
    return %c0_i32, %c0_i32_0 : i32, i32
  }
  func.func @transform_2(%arg0: i32) -> (i32, i32) {
    %c0_i32 = arith.constant 0 : i32
    %c0_i32_0 = arith.constant 0 : i32
    %c0_i32_1 = arith.constant 0 : i32
    return %c0_i32, %c0_i32_0 : i32, i32
  }
  func.func @transform_3(%arg0: i32) -> (i32, i32) {
    %c0_i32 = arith.constant 0 : i32
    %c0_i32_0 = arith.constant 0 : i32
    return %arg0, %c0_i32 : i32, i32
  }
}

</mosaic_0001>

<bundles_post_ra>
// kernel: tpu_custom_call.1
= control target key start
LH: loop header
LB: loop body
LE: loop exit
PB: predicated region body
PF: predicated region fallthrough
CT: control target
= control target key end

     0   :  { %8 = vsyncpa [#allocation3], 0  ;;  %s353_s0 = inlined_call_operand.hbm [shape: f32[8,16], index: 0, kind: input, shape index: {}]   ;;  %s354_s1 = inlined_call_operand.hbm [shape: f32[16,384], index: 1, kind: input, shape index: {}]   ;;  %s355_s2 = inlined_call_operand.vmem [shape: f32[1,384], index: 2, kind: input, shape index: {}]   ;;  %s356_s3 = inlined_call_operand.hbm [shape: f32[8,384], index: 3, kind: output, shape index: {}]  }
   0x1   :  { %9 = vsyncpa [#allocation6], 0 }
   0x2   :  { %10 = vsyncpa [#allocation4], 0  ;;  %s314_s12 = smov [#allocation2]   ;;  %s315_s14 = smov [#allocation5]  }
   0x3   :  { %s17_s13 = sshll.u32 %s314_s12, 4  ;;  %s26_s15 = sshll.u32 %s315_s14, 4  ;;  %s18_s13 = int_to_ptr.vmem [resolvable:$true] %s17_s13  ;;  %s27_s15 = int_to_ptr.vmem [resolvable:$true] %s26_s15 }
   0x4   :  { %s256_s16 = scalar_lea.vmem %s18_s13, 128  ;;  %p261_p1 = scmp.lt.s32.totalorder %s18_s13, %s18_s13 }
   0x5   :  { %p257_p0 = scmp.ne.s32.totalorder %s18_s13, %s256_s16  ;;  %p262_p2 = scmp.lt.s32.totalorder %s256_s16, %s256_s16 }
   0x7   :  { %p263_p3 = por %p262_p2, %p261_p1 }
   0x9   :  { %p264_p4 = pnand %p263_p3, %p257_p0 }
   0xb   :  { %267 = shalt.err (!%p264_p4)
}
   0xc   :  { %20 = dma.hbm_to_vmem [thread:$0]  %s353_s0, 128, %s18_s13, [#allocation3]  }
   0xd   :  { %s276_s19 = scalar_lea.vmem %s27_s15, 768  ;;  %p281_p6 = scmp.lt.s32.totalorder %s27_s15, %s27_s15 }
   0xe   :  { %p277_p5 = scmp.ne.s32.totalorder %s27_s15, %s276_s19  ;;  %p282_p7 = scmp.lt.s32.totalorder %s276_s19, %s276_s19 }
  0x10   :  { %p283_p8 = por %p282_p7, %p281_p6 }
  0x12   :  { %p284_p9 = pnand %p283_p8, %p277_p5 }
  0x14   :  { %287 = shalt.err (!%p284_p9)
}
  0x15   :  { %s316_s20 = smov 384   ;;  %s317_s21 = smov 24  }
  0x16   :  { %32 = dma.hbm_to_vmem [thread:$0]  %s354_s1, 768, %s27_s15, [#allocation6], %s316_s20, %s316_s20, %s317_s21  }
  0x17   :  { %308 = dma.done.wait [#allocation3], 128  }
  0x18   :  { %309 = vsyncadd [#allocation3], 4294967168 }
  0x19   :  { %310 = dma.done.wait [#allocation6], 768  }
  0x1a   :  { %311 = vsyncadd [#allocation6], 4294966528  ;;  %v318_v0 = vmov 0.0   ;;  %vm319_vm0 = vmmov 0   ;;  %v46_v1 = vld [vmem:[#allocation5 + $0x20] sm:$0xff]  ;;  %v45_v2 = vld [vmem:[#allocation5 + $0x18] sm:$0xff]  ;;  %v50_v8 = vlaneseq }
  0x1b   :  { %234 = vmatprep.subr.mxu1 %v318_v0  ;;  %133 = vmatprep.mubr.f32.mxu0 %v318_v0  ;;  %v47_v3 = vld [vmem:[#allocation5 + $0x28] sm:$0xff]  ;;  %v42_v5 = vld [vmem:[#allocation5] sm:$0xff]  ;;  %v44_v6 = vld [vmem:[#allocation5 + $0x10] sm:$0xff]  ;;  %vm65_vm1 = vcmask 130048   ;;  %s320_s24 = smov [#allocation7]  }
  0x1c   :  { %238 = vmatprep.mubr.msk.f32.mxu1 %vm319_vm0, %v318_v0  ;;  %97 = vmatprep.subr.mxu0 %v46_v1  ;;  %v43_v4 = vld [vmem:[#allocation5 + $0x8] sm:$0xff]  ;;  %v41_v7 = vld [vmem:[#allocation2] sm:$0xff]  ;;  %v51_v9 = vshrl.u32 %v50_v8, 7  ;;  %s219_s25 = sshll.u32 %s320_s24, 4  ;;  %s220_s25 = int_to_ptr.vmem [resolvable:$true] %s219_s25 }
  0x1d   :  { %235 = vmatpush3.msra.mxu1 %v47_v3  ;;  %98 = vmatpush1.msra.mxu0 %v45_v2  ;;  %v48_v12 = vld [vmem:[%s355_s2] sm:$0x7]  ;;  %s288_s26 = scalar_lea.vmem %s220_s25, 384  ;;  %p293_p11 = scmp.lt.s32.totalorder %s220_s25, %s220_s25 }
  0x1e   :  { %236 = vmatprep.subr.mxu1 %v318_v0  ;;  %99 = vmatprep.subr.mxu0 %v43_v4  ;;  %v60_v10 = vsub.s32 2, %v51_v9  ;;  %v52_v11 = vsub.s32 0, %v51_v9  ;;  %v56_v13 = vsub.s32 1, %v51_v9  ;;  %p289_p10 = scmp.ne.s32.totalorder %s220_s25, %s288_s26  ;;  %p294_p12 = scmp.lt.s32.totalorder %s288_s26, %s288_s26 }
  0x1f   :  { %237 = vmatpush3.msra.mxu1 %v44_v6  ;;  %100 = vmatpush1.msra.mxu0 %v42_v5 }
  0x20   :  { %239 = vmatmul.mubr.msk.f32.vlgmr.msra.gmra.mxu1 %vm65_vm1, %v41_v7  ;;  %229 = vmatmul.mubr.msk.f32.vlgmr.msra.gmra.mxu0 %vm65_vm1, %v41_v7  ;;  %v61_v14 = vrot.slane %v48_v12, %v60_v10  ;;  %v53_v15 = vrot.slane %v48_v12, %v52_v11  ;;  %v57_v17 = vrot.slane %v48_v12, %v56_v13  ;;  %p295_p13 = por %p294_p12, %p293_p11 }
  0x22   :  { %p296_p0 = pnand %p295_p13, %p289_p10 }
  0xe0   :  { %v206_v16 = vpop.f32.mrf.mxu1  ;;  %v135_v18 = vpop.f32.mrf.mxu0 }
  0xe1   :  { %v207_v19 = vadd.f32 %v206_v16, %v61_v14  ;;  %v136_v20 = vadd.f32 %v135_v18, %v53_v15 }
  0xe2   :  { %v240_v21 = vpop.f32.mrf.mxu1  ;;  %v137_v22 = vpop.f32.mrf.mxu0 }
  0xe3   :  { %212 = vst [vmem:[#allocation7 + $0x10] sm:$0xff] %v207_v19  ;;  %210 = vst [vmem:[#allocation7] sm:$0xff] %v136_v20  ;;  %v138_v23 = vadd.f32 %v137_v22, %v57_v17 }
  0xe5   :  { %211 = vst [vmem:[#allocation7 + $0x8] sm:$0xff] %v138_v23 }
  0xe6   :  { %299 = shalt.err (!%p296_p0)
}
  0xe7   :  { %222 = dma.vmem_to_hbm [thread:$0]  %s220_s25, 384, %s356_s3, [#allocation4]  }
  0xe8   :  { %312 = dma.done.wait [#allocation4], 384  }
  0xe9   :  { %313 = vsyncadd [#allocation4], 4294966912 }
  0xea   :  { %226 = vsyncpa [#allocation3], 1 }
  0xeb   :  { %227 = vsyncpa [#allocation6], 1 }
  0xec   :  { %228 = vsyncpa [#allocation4], 1 }

</bundles_post_ra>
